<compile_context>
chip_gen: v5e
topology: v5e:2x2
jax: 0.10.0
libtpu: 0.0.40
codegen_flags: <defaults>
</compile_context>

<pallas_src>
import jax
import jax.numpy as jnp
from jax import lax
from jax.experimental import pallas as pl
from jax.experimental.pallas import tpu as pltpu

IN_FEATURES = 2048
OUT_FEATURES = 16
EPS = 1e-12  # F.normalize default eps


def _round_up(n: int, m: int) -> int:
    return ((n + m - 1) // m) * m


def linear_normalize_kernel(x_ref, wt_ref, b_ref, o_ref):
    # x_ref : (TB, 2048)   VMEM batch tile
    # wt_ref: (2048, 16)   VMEM, resident across grid (constant index_map)
    # b_ref : (1, 16)      VMEM
    # o_ref : (TB, 16)     VMEM
    y = jnp.dot(x_ref[...], wt_ref[...], preferred_element_type=jnp.float32)
    y = y + b_ref[...]
    # F.normalize: y / max(||y||, eps)  ==  y * rsqrt(max(||y||^2, eps^2))
    sq = jnp.sum(y * y, axis=-1, keepdims=True)
    inv = lax.rsqrt(jnp.maximum(sq, EPS * EPS))
    o_ref[...] = (y * inv).astype(o_ref.dtype)


def linear_normalize(x, weight, bias, *, block_b: int = 1024):
    """x: (B, 2048); weight: (16, 2048) (PyTorch layout); bias: (16,) -> (B, 16)."""
    B = x.shape[0]

    if B <= 8:
        # Tiny batch: single full-extent block (block_shape == array dims is legal).
        TB = B
    else:
        # Multiple of 8 (sublane alignment), capped at block_b, sized so the grid
        # has >= 2 blocks (v7x megacore split over the batch).
        TB = max(8, min(block_b, _round_up(pl.cdiv(B, 2), 8)))
    num_blocks = pl.cdiv(B, TB)  # ragged last block handled by masked writes

    # One-time 128 KiB transpose -> canonical (K, N) MXU feed; no per-step XLU work.
    w_t = jnp.asarray(weight).T                      # (2048, 16)
    b2 = jnp.asarray(bias).reshape(1, OUT_FEATURES)  # (1, 16)

    # Right-size the VMEM limit: double-buffered x tile dominates (~16 MiB at TB=1024).
    footprint = 4 * (2 * TB * IN_FEATURES          # x tile, double buffered
                     + 2 * IN_FEATURES * OUT_FEATURES  # resident weight buffers
                     + 2 * TB * OUT_FEATURES           # output tile, double buffered
                     + OUT_FEATURES)                   # bias
    vmem_limit = int(max(16 << 20, min(48 << 20, footprint + (4 << 20))))

    return pl.pallas_call(
        linear_normalize_kernel,
        out_shape=jax.ShapeDtypeStruct((B, OUT_FEATURES), x.dtype),
        grid=(num_blocks,),
        in_specs=[
            pl.BlockSpec((TB, IN_FEATURES), lambda i: (i, 0)),
            # Weight & bias: constant block index -> stay resident, never re-DMA'd.
            pl.BlockSpec((IN_FEATURES, OUT_FEATURES), lambda i: (0, 0)),
            pl.BlockSpec((1, OUT_FEATURES), lambda i: (0, 0)),
        ],
        out_specs=pl.BlockSpec((TB, OUT_FEATURES), lambda i: (i, 0)),
        compiler_params=pltpu.CompilerParams(
            dimension_semantics=("parallel",),   # batch tiles shard across TCs on v7x
            vmem_limit_bytes=vmem_limit,
        ),
    )(x, w_t, b2)


if __name__ == "__main__":
    key = jax.random.PRNGKey(0)
    kx, kw, kb = jax.random.split(key, 3)

    B = 6  # small batch, deliberately not a multiple of 8
    # PyTorch-style uniform(-1/sqrt(fan_in), 1/sqrt(fan_in)) init, deterministic.
    bound = 1.0 / (IN_FEATURES ** 0.5)
    weight = jax.random.uniform(kw, (OUT_FEATURES, IN_FEATURES),
                                minval=-bound, maxval=bound, dtype=jnp.float32)
    bias = jax.random.uniform(kb, (OUT_FEATURES,),
                              minval=-bound, maxval=bound, dtype=jnp.float32)
    x = jax.random.normal(kx, (B, IN_FEATURES), dtype=jnp.float32)

    out = jax.block_until_ready(linear_normalize(x, weight, bias))

    # Reference check (pure JAX): F.normalize(linear(x)) semantics.
    y_ref = x @ weight.T + bias
    y_ref = y_ref / jnp.maximum(jnp.linalg.norm(y_ref, axis=1, keepdims=True), EPS)
    assert out.shape == (B, OUT_FEATURES)
    assert jnp.allclose(out, y_ref, atol=1e-5, rtol=1e-5), float(jnp.max(jnp.abs(out - y_ref)))

    print("KERNEL_OK")
</pallas_src>

<mosaic_0001>
module attributes {stable_mosaic.version = 11 : i64} {
  func.func @linear_normalize_kernel(%arg0: i32, %arg1: memref<6x2048xf32, #tpu.memory_space<vmem>>, %arg2: memref<2048x16xf32, #tpu.memory_space<vmem>>, %arg3: memref<1x16xf32, #tpu.memory_space<vmem>>, %arg4: memref<6x16xf32, #tpu.memory_space<vmem>>) attributes {dimension_semantics = [#tpu.dimension_semantics<parallel>], iteration_bounds = array<i64: 1>, scalar_prefetch = 0 : i64, scratch_operands = 0 : i64, tpu.core_type = #tpu.core_type<tc>, window_params = [{transform_indices = @transform_0, window_bounds = array<i64: 6, 2048>}, {pipeline_mode = #tpu.pipeline_mode<synchronous>, transform_indices = @transform_1, window_bounds = array<i64: 2048, 16>}, {pipeline_mode = #tpu.pipeline_mode<synchronous>, transform_indices = @transform_2, window_bounds = array<i64: 1, 16>}, {transform_indices = @transform_3, window_bounds = array<i64: 6, 16>}]} {
    %c0 = arith.constant 0 : index
    %c0_0 = arith.constant 0 : index
    %0 = vector.load %arg1[%c0, %c0_0] : memref<6x2048xf32, #tpu.memory_space<vmem>>, vector<6x2048xf32>
    %c0_1 = arith.constant 0 : index
    %c0_2 = arith.constant 0 : index
    %1 = vector.load %arg2[%c0_1, %c0_2] : memref<2048x16xf32, #tpu.memory_space<vmem>>, vector<2048x16xf32>
    %cst = arith.constant dense<0.000000e+00> : vector<6x16xf32>
    %2 = tpu.matmul %0, %1, %cst {dimension_numbers = #tpu.dot_dimension_numbers<[1], [0], [0], [1], [0, 0, 1, 1], [], []>} : vector<6x2048xf32>, vector<2048x16xf32>, vector<6x16xf32> -> vector<6x16xf32>
    %c0_3 = arith.constant 0 : index
    %c0_4 = arith.constant 0 : index
    %3 = vector.load %arg3[%c0_3, %c0_4] : memref<1x16xf32, #tpu.memory_space<vmem>>, vector<1x16xf32>
    %4 = vector.broadcast %3 : vector<1x16xf32> to vector<6x16xf32>
    %5 = arith.addf %2, %4 : vector<6x16xf32>
    %6 = arith.mulf %5, %5 : vector<6x16xf32>
    %cst_5 = arith.constant dense<0.000000e+00> : vector<6xf32>
    %7 = vector.multi_reduction <add>, %6, %cst_5 [1] : vector<6x16xf32> to vector<6xf32>
    %8 = vector.shape_cast %7 : vector<6xf32> to vector<6x1xf32>
    %cst_6 = arith.constant 1.000000e-24 : f32
    %9 = vector.broadcast %cst_6 : f32 to vector<6x1xf32>
    %10 = arith.maximumf %8, %9 : vector<6x1xf32>
    %11 = math.rsqrt %10 : vector<6x1xf32>
    %12 = vector.broadcast %11 : vector<6x1xf32> to vector<6x16xf32>
    %13 = arith.mulf %5, %12 : vector<6x16xf32>
    %c0_7 = arith.constant 0 : index
    %c0_8 = arith.constant 0 : index
    %14 = vector.load %arg4[%c0_7, %c0_8] : memref<6x16xf32, #tpu.memory_space<vmem>>, vector<6x16xf32>
    tpu.vector_store %arg4[%c0_7, %c0_8], %13 {strides = array<i32>} : memref<6x16xf32, #tpu.memory_space<vmem>>, vector<6x16xf32>,
    return
  }
  func.func @transform_0(%arg0: i32) -> (i32, i32) {
    %c0_i32 = arith.constant 0 : i32
    %c0_i32_0 = arith.constant 0 : i32
    return %arg0, %c0_i32 : i32, i32
  }
  func.func @transform_1(%arg0: i32) -> (i32, i32) {
    %c0_i32 = arith.constant 0 : i32
    %c0_i32_0 = arith.constant 0 : i32
    %c0_i32_1 = arith.constant 0 : i32
    return %c0_i32, %c0_i32_0 : i32, i32
  }
  func.func @transform_2(%arg0: i32) -> (i32, i32) {
    %c0_i32 = arith.constant 0 : i32
    %c0_i32_0 = arith.constant 0 : i32
    %c0_i32_1 = arith.constant 0 : i32
    return %c0_i32, %c0_i32_0 : i32, i32
  }
  func.func @transform_3(%arg0: i32) -> (i32, i32) {
    %c0_i32 = arith.constant 0 : i32
    %c0_i32_0 = arith.constant 0 : i32
    return %arg0, %c0_i32 : i32, i32
  }
}

</mosaic_0001>

<bundles_post_ra>
// kernel: tpu_custom_call.1
= control target key start
LH: loop header
LB: loop body
LE: loop exit
PB: predicated region body
PF: predicated region fallthrough
CT: control target
= control target key end

     0   :  { %s1520_s0 = inlined_call_operand.vmem [shape: f32[6,2048], index: 0, kind: input, shape index: {}]   ;;  %s1521_s1 = inlined_call_operand.vmem [shape: f32[2048,16], index: 1, kind: input, shape index: {}]   ;;  %s1522_s2 = inlined_call_operand.vmem [shape: f32[1,16], index: 2, kind: input, shape index: {}]   ;;  %s1523_s3 = inlined_call_operand.hbm [shape: f32[6,16], index: 3, kind: output, shape index: {}]  }
   0x1   :  { %v46_v0 = vld [vmem:[%s1521_s1 + $0x78] sm:$0xff]  ;;  %v45_v2 = vld [vmem:[%s1521_s1 + $0x70] sm:$0xff]  ;;  %v44_v6 = vld [vmem:[%s1521_s1 + $0x68] sm:$0xff] }
   0x2   :  { %v78_v1 = vld [vmem:[%s1521_s1 + $0x178] sm:$0xff]  ;;  %291 = vmatpush.msra.mxu0 %v46_v0  ;;  %v77_v4 = vld [vmem:[%s1521_s1 + $0x170] sm:$0xff]  ;;  %v76_v8 = vld [vmem:[%s1521_s1 + $0x168] sm:$0xff] }
   0x3   :  { %331 = vmatpush.msra.mxu2 %v78_v1  ;;  %v62_v3 = vld [vmem:[%s1521_s1 + $0xf8] sm:$0xff]  ;;  %v61_v7 = vld [vmem:[%s1521_s1 + $0xf0] sm:$0xff]  ;;  %v60_v10 = vld [vmem:[%s1521_s1 + $0xe8] sm:$0xff] }
   0x4   :  { %v94_v5 = vld [vmem:[%s1521_s1 + $0x1f8] sm:$0xff]  ;;  %311 = vmatpush.msra.mxu1 %v62_v3  ;;  %292 = vmatpush.msra.mxu0 %v45_v2  ;;  %v93_v9 = vld [vmem:[%s1521_s1 + $0x1f0] sm:$0xff]  ;;  %v43_v11 = vld [vmem:[%s1521_s1 + $0x60] sm:$0xff] }
   0x5   :  { %351 = vmatpush.msra.mxu3 %v94_v5  ;;  %332 = vmatpush.msra.mxu2 %v77_v4  ;;  %v75_v12 = vld [vmem:[%s1521_s1 + $0x160] sm:$0xff]  ;;  %v92_v13 = vld [vmem:[%s1521_s1 + $0x1e8] sm:$0xff]  ;;  %v42_v16 = vld [vmem:[%s1521_s1 + $0x58] sm:$0xff] }
   0x6   :  { %312 = vmatpush.msra.mxu1 %v61_v7  ;;  %293 = vmatpush.msra.mxu0 %v44_v6  ;;  %v59_v14 = vld [vmem:[%s1521_s1 + $0xe0] sm:$0xff]  ;;  %v74_v17 = vld [vmem:[%s1521_s1 + $0x158] sm:$0xff]  ;;  %v41_v20 = vld [vmem:[%s1521_s1 + $0x50] sm:$0xff] }
   0x7   :  { %352 = vmatpush.msra.mxu3 %v93_v9  ;;  %333 = vmatpush.msra.mxu2 %v76_v8  ;;  %v91_v15 = vld [vmem:[%s1521_s1 + $0x1e0] sm:$0xff]  ;;  %v58_v18 = vld [vmem:[%s1521_s1 + $0xd8] sm:$0xff]  ;;  %v73_v21 = vld [vmem:[%s1521_s1 + $0x150] sm:$0xff] }
   0x8   :  { %313 = vmatpush.msra.mxu1 %v60_v10  ;;  %294 = vmatpush.msra.mxu0 %v43_v11  ;;  %v90_v19 = vld [vmem:[%s1521_s1 + $0x1d8] sm:$0xff]  ;;  %v57_v22 = vld [vmem:[%s1521_s1 + $0xd0] sm:$0xff]  ;;  %v40_v24 = vld [vmem:[%s1521_s1 + $0x48] sm:$0xff] }
   0x9   :  { %353 = vmatpush.msra.mxu3 %v92_v13  ;;  %334 = vmatpush.msra.mxu2 %v75_v12  ;;  %v89_v23 = vld [vmem:[%s1521_s1 + $0x1d0] sm:$0xff]  ;;  %v72_v25 = vld [vmem:[%s1521_s1 + $0x148] sm:$0xff]  ;;  %v39_v28 = vld [vmem:[%s1521_s1 + $0x40] sm:$0xff] }
   0xa   :  { %314 = vmatpush.msra.mxu1 %v59_v14  ;;  %295 = vmatpush.msra.mxu0 %v42_v16  ;;  %v56_v26 = vld [vmem:[%s1521_s1 + $0xc8] sm:$0xff]  ;;  %v71_v29 = vld [vmem:[%s1521_s1 + $0x140] sm:$0xff]  ;;  %v38_v32 = vld [vmem:[%s1521_s1 + $0x38] sm:$0xff] }
   0xb   :  { %354 = vmatpush.msra.mxu3 %v91_v15  ;;  %335 = vmatpush.msra.mxu2 %v74_v17  ;;  %v88_v27 = vld [vmem:[%s1521_s1 + $0x1c8] sm:$0xff]  ;;  %v55_v30 = vld [vmem:[%s1521_s1 + $0xc0] sm:$0xff]  ;;  %v70_v33 = vld [vmem:[%s1521_s1 + $0x138] sm:$0xff] }
   0xc   :  { %315 = vmatpush.msra.mxu1 %v58_v18  ;;  %296 = vmatpush.msra.mxu0 %v41_v20  ;;  %v87_v31 = vld [vmem:[%s1521_s1 + $0x1c0] sm:$0xff]  ;;  %v54_v34 = vld [vmem:[%s1521_s1 + $0xb8] sm:$0xff]  ;;  %v37_v36 = vld [vmem:[%s1521_s1 + $0x30] sm:$0xff] }
   0xd   :  { %355 = vmatpush.msra.mxu3 %v90_v19  ;;  %336 = vmatpush.msra.mxu2 %v73_v21  ;;  %v86_v35 = vld [vmem:[%s1521_s1 + $0x1b8] sm:$0xff]  ;;  %v69_v37 = vld [vmem:[%s1521_s1 + $0x130] sm:$0xff]  ;;  %v36_v40 = vld [vmem:[%s1521_s1 + $0x28] sm:$0xff] }
   0xe   :  { %316 = vmatpush.msra.mxu1 %v57_v22  ;;  %297 = vmatpush.msra.mxu0 %v40_v24  ;;  %v53_v38 = vld [vmem:[%s1521_s1 + $0xb0] sm:$0xff]  ;;  %v68_v41 = vld [vmem:[%s1521_s1 + $0x128] sm:$0xff]  ;;  %v35_v44 = vld [vmem:[%s1521_s1 + $0x20] sm:$0xff] }
   0xf   :  { %356 = vmatpush.msra.mxu3 %v89_v23  ;;  %337 = vmatpush.msra.mxu2 %v72_v25  ;;  %v85_v39 = vld [vmem:[%s1521_s1 + $0x1b0] sm:$0xff]  ;;  %v52_v42 = vld [vmem:[%s1521_s1 + $0xa8] sm:$0xff]  ;;  %v67_v45 = vld [vmem:[%s1521_s1 + $0x120] sm:$0xff] }
  0x10   :  { %317 = vmatpush.msra.mxu1 %v56_v26  ;;  %298 = vmatpush.msra.mxu0 %v39_v28  ;;  %v84_v43 = vld [vmem:[%s1521_s1 + $0x1a8] sm:$0xff]  ;;  %v51_v46 = vld [vmem:[%s1521_s1 + $0xa0] sm:$0xff]  ;;  %v34_v48 = vld [vmem:[%s1521_s1 + $0x18] sm:$0xff] }
  0x11   :  { %357 = vmatpush.msra.mxu3 %v88_v27  ;;  %338 = vmatpush.msra.mxu2 %v71_v29  ;;  %v83_v47 = vld [vmem:[%s1521_s1 + $0x1a0] sm:$0xff]  ;;  %v66_v49 = vld [vmem:[%s1521_s1 + $0x118] sm:$0xff]  ;;  %v33_v52 = vld [vmem:[%s1521_s1 + $0x10] sm:$0xff] }
  0x12   :  { %318 = vmatpush.msra.mxu1 %v55_v30  ;;  %299 = vmatpush.msra.mxu0 %v38_v32  ;;  %v50_v50 = vld [vmem:[%s1521_s1 + $0x98] sm:$0xff]  ;;  %v65_v53 = vld [vmem:[%s1521_s1 + $0x110] sm:$0xff]  ;;  %v32_v56 = vld [vmem:[%s1521_s1 + $0x8] sm:$0xff] }
  0x13   :  { %358 = vmatpush.msra.mxu3 %v87_v31  ;;  %339 = vmatpush.msra.mxu2 %v70_v33  ;;  %v82_v51 = vld [vmem:[%s1521_s1 + $0x198] sm:$0xff]  ;;  %v49_v54 = vld [vmem:[%s1521_s1 + $0x90] sm:$0xff]  ;;  %v64_v57 = vld [vmem:[%s1521_s1 + $0x108] sm:$0xff] }
  0x14   :  { %319 = vmatpush.msra.mxu1 %v54_v34  ;;  %300 = vmatpush.msra.mxu0 %v37_v36  ;;  %v81_v55 = vld [vmem:[%s1521_s1 + $0x190] sm:$0xff]  ;;  %v48_v58 = vld [vmem:[%s1521_s1 + $0x88] sm:$0xff]  ;;  %v31_v60 = vld [vmem:[%s1521_s1] sm:$0xff] }
  0x15   :  { %359 = vmatpush.msra.mxu3 %v86_v35  ;;  %340 = vmatpush.msra.mxu2 %v69_v37  ;;  %v80_v59 = vld [vmem:[%s1521_s1 + $0x188] sm:$0xff]  ;;  %v63_v61 = vld [vmem:[%s1521_s1 + $0x100] sm:$0xff]  ;;  %v110_v62 = vld [vmem:[%s1521_s1 + $0x278] sm:$0xff] }
  0x16   :  { %320 = vmatpush.msra.mxu1 %v53_v38  ;;  %301 = vmatpush.msra.mxu0 %v36_v40  ;;  %v142_v63 = vld [vmem:[%s1521_s1 + $0x378] sm:$0xff]  ;;  %v47_v0 = vld [vmem:[%s1521_s1 + $0x80] sm:$0xff]  ;;  %v109_v2 = vld [vmem:[%s1521_s1 + $0x270] sm:$0xff] }
  0x17   :  { %360 = vmatpush.msra.mxu3 %v85_v39  ;;  %341 = vmatpush.msra.mxu2 %v68_v41  ;;  %v79_v1 = vld [vmem:[%s1521_s1 + $0x180] sm:$0xff]  ;;  %v126_v3 = vld [vmem:[%s1521_s1 + $0x2f8] sm:$0xff]  ;;  %v141_v4 = vld [vmem:[%s1521_s1 + $0x370] sm:$0xff] }
  0x18   :  { %321 = vmatpush.msra.mxu1 %v52_v42  ;;  %302 = vmatpush.msra.mxu0 %v35_v44  ;;  %v158_v5 = vld [vmem:[%s1521_s1 + $0x3f8] sm:$0xff]  ;;  %v108_v6 = vld [vmem:[%s1521_s1 + $0x268] sm:$0xff]  ;;  %v125_v7 = vld [vmem:[%s1521_s1 + $0x2f0] sm:$0xff] }
  0x19   :  { %361 = vmatpush.msra.mxu3 %v84_v43  ;;  %342 = vmatpush.msra.mxu2 %v67_v45  ;;  %v140_v8 = vld [vmem:[%s1521_s1 + $0x368] sm:$0xff]  ;;  %v157_v9 = vld [vmem:[%s1521_s1 + $0x3f0] sm:$0xff]  ;;  %v107_v10 = vld [vmem:[%s1521_s1 + $0x260] sm:$0xff] }
  0x1a   :  { %322 = vmatpush.msra.mxu1 %v51_v46  ;;  %303 = vmatpush.msra.mxu0 %v34_v48  ;;  %v124_v11 = vld [vmem:[%s1521_s1 + $0x2e8] sm:$0xff]  ;;  %v139_v12 = vld [vmem:[%s1521_s1 + $0x360] sm:$0xff]  ;;  %v106_v14 = vld [vmem:[%s1521_s1 + $0x258] sm:$0xff] }
  0x1b   :  { %362 = vmatpush.msra.mxu3 %v83_v47  ;;  %343 = vmatpush.msra.mxu2 %v66_v49  ;;  %v156_v13 = vld [vmem:[%s1521_s1 + $0x3e8] sm:$0xff]  ;;  %v123_v15 = vld [vmem:[%s1521_s1 + $0x2e0] sm:$0xff]  ;;  %v138_v16 = vld [vmem:[%s1521_s1 + $0x358] sm:$0xff] }
  0x1c   :  { %323 = vmatpush.msra.mxu1 %v50_v50  ;;  %304 = vmatpush.msra.mxu0 %v33_v52  ;;  %v155_v17 = vld [vmem:[%s1521_s1 + $0x3e0] sm:$0xff]  ;;  %v105_v18 = vld [vmem:[%s1521_s1 + $0x250] sm:$0xff]  ;;  %v122_v19 = vld [vmem:[%s1521_s1 + $0x2d8] sm:$0xff] }
  0x1d   :  { %363 = vmatpush.msra.mxu3 %v82_v51  ;;  %344 = vmatpush.msra.mxu2 %v65_v53  ;;  %v137_v20 = vld [vmem:[%s1521_s1 + $0x350] sm:$0xff]  ;;  %v154_v21 = vld [vmem:[%s1521_s1 + $0x3d8] sm:$0xff]  ;;  %v104_v22 = vld [vmem:[%s1521_s1 + $0x248] sm:$0xff] }
  0x1e   :  { %324 = vmatpush.msra.mxu1 %v49_v54  ;;  %305 = vmatpush.msra.mxu0 %v32_v56  ;;  %v121_v23 = vld [vmem:[%s1521_s1 + $0x2d0] sm:$0xff]  ;;  %v136_v24 = vld [vmem:[%s1521_s1 + $0x348] sm:$0xff]  ;;  %v103_v26 = vld [vmem:[%s1521_s1 + $0x240] sm:$0xff] }
  0x1f   :  { %364 = vmatpush.msra.mxu3 %v81_v55  ;;  %345 = vmatpush.msra.mxu2 %v64_v57  ;;  %v153_v25 = vld [vmem:[%s1521_s1 + $0x3d0] sm:$0xff]  ;;  %v120_v27 = vld [vmem:[%s1521_s1 + $0x2c8] sm:$0xff]  ;;  %v135_v28 = vld [vmem:[%s1521_s1 + $0x340] sm:$0xff] }
  0x20   :  { %325 = vmatpush.msra.mxu1 %v48_v58  ;;  %306 = vmatpush.msra.mxu0 %v31_v60  ;;  %v152_v29 = vld [vmem:[%s1521_s1 + $0x3c8] sm:$0xff]  ;;  %v102_v30 = vld [vmem:[%s1521_s1 + $0x238] sm:$0xff]  ;;  %v119_v31 = vld [vmem:[%s1521_s1 + $0x2c0] sm:$0xff] }
  0x21   :  { %365 = vmatpush.msra.mxu3 %v80_v59  ;;  %346 = vmatpush.msra.mxu2 %v63_v61  ;;  %v134_v32 = vld [vmem:[%s1521_s1 + $0x338] sm:$0xff]  ;;  %v151_v33 = vld [vmem:[%s1521_s1 + $0x3c0] sm:$0xff]  ;;  %v101_v34 = vld [vmem:[%s1521_s1 + $0x230] sm:$0xff] }
  0x22   :  { %371 = vmatpush.msrb.mxu0 %v110_v62  ;;  %326 = vmatpush.msra.mxu1 %v47_v0  ;;  %v118_v35 = vld [vmem:[%s1521_s1 + $0x2b8] sm:$0xff]  ;;  %v133_v36 = vld [vmem:[%s1521_s1 + $0x330] sm:$0xff]  ;;  %v100_v38 = vld [vmem:[%s1521_s1 + $0x228] sm:$0xff] }
  0x23   :  { %411 = vmatpush.msrb.mxu2 %v142_v63  ;;  %366 = vmatpush.msra.mxu3 %v79_v1  ;;  %v150_v37 = vld [vmem:[%s1521_s1 + $0x3b8] sm:$0xff]  ;;  %v117_v39 = vld [vmem:[%s1521_s1 + $0x2b0] sm:$0xff]  ;;  %v132_v40 = vld [vmem:[%s1521_s1 + $0x328] sm:$0xff] }
  0x24   :  { %372 = vmatpush.msrb.mxu0 %v109_v2  ;;  %391 = vmatpush.msrb.mxu1 %v126_v3  ;;  %v149_v41 = vld [vmem:[%s1521_s1 + $0x3b0] sm:$0xff]  ;;  %v99_v42 = vld [vmem:[%s1521_s1 + $0x220] sm:$0xff]  ;;  %v116_v43 = vld [vmem:[%s1521_s1 + $0x2a8] sm:$0xff] }
  0x25   :  { %412 = vmatpush.msrb.mxu2 %v141_v4  ;;  %431 = vmatpush.msrb.mxu3 %v158_v5  ;;  %v131_v44 = vld [vmem:[%s1521_s1 + $0x320] sm:$0xff]  ;;  %v148_v45 = vld [vmem:[%s1521_s1 + $0x3a8] sm:$0xff]  ;;  %v98_v46 = vld [vmem:[%s1521_s1 + $0x218] sm:$0xff] }
  0x26   :  { %373 = vmatpush.msrb.mxu0 %v108_v6  ;;  %392 = vmatpush.msrb.mxu1 %v125_v7  ;;  %v115_v47 = vld [vmem:[%s1521_s1 + $0x2a0] sm:$0xff]  ;;  %v130_v48 = vld [vmem:[%s1521_s1 + $0x318] sm:$0xff]  ;;  %v97_v50 = vld [vmem:[%s1521_s1 + $0x210] sm:$0xff] }
  0x27   :  { %413 = vmatpush.msrb.mxu2 %v140_v8  ;;  %432 = vmatpush.msrb.mxu3 %v157_v9  ;;  %v147_v49 = vld [vmem:[%s1521_s1 + $0x3a0] sm:$0xff]  ;;  %v114_v51 = vld [vmem:[%s1521_s1 + $0x298] sm:$0xff]  ;;  %v129_v52 = vld [vmem:[%s1521_s1 + $0x310] sm:$0xff] }
  0x28   :  { %374 = vmatpush.msrb.mxu0 %v107_v10  ;;  %393 = vmatpush.msrb.mxu1 %v124_v11  ;;  %v146_v53 = vld [vmem:[%s1521_s1 + $0x398] sm:$0xff]  ;;  %v96_v54 = vld [vmem:[%s1521_s1 + $0x208] sm:$0xff]  ;;  %v113_v55 = vld [vmem:[%s1521_s1 + $0x290] sm:$0xff] }
  0x29   :  { %414 = vmatpush.msrb.mxu2 %v139_v12  ;;  %433 = vmatpush.msrb.mxu3 %v156_v13  ;;  %v128_v56 = vld [vmem:[%s1521_s1 + $0x308] sm:$0xff]  ;;  %v145_v57 = vld [vmem:[%s1521_s1 + $0x390] sm:$0xff]  ;;  %v95_v58 = vld [vmem:[%s1521_s1 + $0x200] sm:$0xff] }
  0x2a   :  { %375 = vmatpush.msrb.mxu0 %v106_v14  ;;  %394 = vmatpush.msrb.mxu1 %v123_v15  ;;  %v112_v59 = vld [vmem:[%s1521_s1 + $0x288] sm:$0xff]  ;;  %v127_v60 = vld [vmem:[%s1521_s1 + $0x300] sm:$0xff]  ;;  %v17_v63 = vld [vmem:[%s1520_s0 + $0x10] sm:$0x3f] }
  0x2b   :  { %415 = vmatpush.msrb.mxu2 %v138_v16  ;;  %434 = vmatpush.msrb.mxu3 %v155_v17  ;;  %v144_v61 = vld [vmem:[%s1521_s1 + $0x388] sm:$0xff]  ;;  %v15_v62 = vld [vmem:[%s1520_s0] sm:$0x3f]  ;;  %v174_v0 = vld [vmem:[%s1521_s1 + $0x478] sm:$0xff] }
  0x2c   :  { %376 = vmatpush.msrb.mxu0 %v105_v18  ;;  %395 = vmatpush.msrb.mxu1 %v122_v19  ;;  %v206_v1 = vld [vmem:[%s1521_s1 + $0x578] sm:$0xff]  ;;  %v111_v2 = vld [vmem:[%s1521_s1 + $0x280] sm:$0xff]  ;;  %v16_v4 = vld [vmem:[%s1520_s0 + $0x8] sm:$0x3f] }
  0x2d   :  { %416 = vmatpush.msrb.mxu2 %v137_v20  ;;  %435 = vmatpush.msrb.mxu3 %v154_v21  ;;  %v143_v3 = vld [vmem:[%s1521_s1 + $0x380] sm:$0xff]  ;;  %v18_v5 = vld [vmem:[%s1520_s0 + $0x18] sm:$0x3f]  ;;  %v173_v6 = vld [vmem:[%s1521_s1 + $0x470] sm:$0xff] }
  0x2e   :  { %377 = vmatpush.msrb.mxu0 %v104_v22  ;;  %396 = vmatpush.msrb.mxu1 %v121_v23  ;;  %v190_v7 = vld [vmem:[%s1521_s1 + $0x4f8] sm:$0xff] }
  0x2f   :  { %417 = vmatpush.msrb.mxu2 %v136_v24  ;;  %436 = vmatpush.msrb.mxu3 %v153_v25 }
  0x30   :  { %378 = vmatpush.msrb.mxu0 %v103_v26  ;;  %397 = vmatpush.msrb.mxu1 %v120_v27 }
  0x31   :  { %418 = vmatpush.msrb.mxu2 %v135_v28  ;;  %437 = vmatpush.msrb.mxu3 %v152_v29 }
  0x32   :  { %379 = vmatpush.msrb.mxu0 %v102_v30  ;;  %398 = vmatpush.msrb.mxu1 %v119_v31 }
  0x33   :  { %419 = vmatpush.msrb.mxu2 %v134_v32  ;;  %438 = vmatpush.msrb.mxu3 %v151_v33 }
  0x34   :  { %380 = vmatpush.msrb.mxu0 %v101_v34  ;;  %399 = vmatpush.msrb.mxu1 %v118_v35 }
  0x35   :  { %420 = vmatpush.msrb.mxu2 %v133_v36  ;;  %439 = vmatpush.msrb.mxu3 %v150_v37 }
  0x36   :  { %381 = vmatpush.msrb.mxu0 %v100_v38  ;;  %400 = vmatpush.msrb.mxu1 %v117_v39 }
  0x37   :  { %421 = vmatpush.msrb.mxu2 %v132_v40  ;;  %440 = vmatpush.msrb.mxu3 %v149_v41 }
  0x38   :  { %382 = vmatpush.msrb.mxu0 %v99_v42  ;;  %401 = vmatpush.msrb.mxu1 %v116_v43 }
  0x39   :  { %422 = vmatpush.msrb.mxu2 %v131_v44  ;;  %441 = vmatpush.msrb.mxu3 %v148_v45 }
  0x3a   :  { %383 = vmatpush.msrb.mxu0 %v98_v46  ;;  %402 = vmatpush.msrb.mxu1 %v115_v47 }
  0x3b   :  { %423 = vmatpush.msrb.mxu2 %v130_v48  ;;  %442 = vmatpush.msrb.mxu3 %v147_v49 }
  0x3c   :  { %384 = vmatpush.msrb.mxu0 %v97_v50  ;;  %403 = vmatpush.msrb.mxu1 %v114_v51 }
  0x3d   :  { %424 = vmatpush.msrb.mxu2 %v129_v52  ;;  %443 = vmatpush.msrb.mxu3 %v146_v53 }
  0x3e   :  { %385 = vmatpush.msrb.mxu0 %v96_v54  ;;  %404 = vmatpush.msrb.mxu1 %v113_v55 }
  0x3f   :  { %425 = vmatpush.msrb.mxu2 %v128_v56  ;;  %444 = vmatpush.msrb.mxu3 %v145_v57 }
  0x40   :  { %386 = vmatpush.msrb.mxu0 %v95_v58  ;;  %405 = vmatpush.msrb.mxu1 %v112_v59 }
  0x41   :  { %426 = vmatpush.msrb.mxu2 %v127_v60  ;;  %445 = vmatpush.msrb.mxu3 %v144_v61 }
  0x42   :  { %307 = vmatmul.f32.vlgmr.msra.gmra.mxu0 %v15_v62  ;;  %347 = vmatmul.f32.vlgmr.msra.gmra.mxu2 %v17_v63 }
  0x43   :  { %451 = vmatpush.msra.mxu0 %v174_v0  ;;  %491 = vmatpush.msra.mxu2 %v206_v1 }
  0x44   :  { %8 = vsyncpa [#allocation3], 0  ;;  %406 = vmatpush.msrb.mxu1 %v111_v2  ;;  %446 = vmatpush.msrb.mxu3 %v143_v3  ;;  %v205_v8 = vld [vmem:[%s1521_s1 + $0x570] sm:$0xff]  ;;  %v222_v9 = vld [vmem:[%s1521_s1 + $0x5f8] sm:$0xff]  ;;  %vm612_vm0 = vcmask 128000   ;;  %s636_s19 = sshll.u32 %s1523_s3, 4  ;;  %s637_s19 = int_to_ptr.hbm [resolvable:$true] %s636_s19 }
  0x45   :  { %327 = vmatmul.f32.vlgmr.msra.gmra.mxu1 %v16_v4  ;;  %367 = vmatmul.f32.vlgmr.msra.gmra.mxu3 %v18_v5  ;;  %v172_v10 = vld [vmem:[%s1521_s1 + $0x468] sm:$0xff]  ;;  %v189_v11 = vld [vmem:[%s1521_s1 + $0x4f0] sm:$0xff]  ;;  %v171_v14 = vld [vmem:[%s1521_s1 + $0x460] sm:$0xff] }
  0x46   :  { %452 = vmatpush.msra.mxu0 %v173_v6  ;;  %471 = vmatpush.msra.mxu1 %v190_v7  ;;  %v204_v12 = vld [vmem:[%s1521_s1 + $0x568] sm:$0xff]  ;;  %v221_v13 = vld [vmem:[%s1521_s1 + $0x5f0] sm:$0xff]  ;;  %v203_v16 = vld [vmem:[%s1521_s1 + $0x560] sm:$0xff] }
  0x47   :  { %492 = vmatpush.msra.mxu2 %v205_v8  ;;  %511 = vmatpush.msra.mxu3 %v222_v9  ;;  %v188_v15 = vld [vmem:[%s1521_s1 + $0x4e8] sm:$0xff]  ;;  %v21_v18 = vld [vmem:[%s1520_s0 + $0x30] sm:$0x3f]  ;;  %v170_v19 = vld [vmem:[%s1521_s1 + $0x458] sm:$0xff] }
  0x48   :  { %453 = vmatpush.msra.mxu0 %v172_v10  ;;  %472 = vmatpush.msra.mxu1 %v189_v11  ;;  %v220_v17 = vld [vmem:[%s1521_s1 + $0x5e8] sm:$0xff]  ;;  %v187_v20 = vld [vmem:[%s1521_s1 + $0x4e0] sm:$0xff]  ;;  %v202_v21 = vld [vmem:[%s1521_s1 + $0x558] sm:$0xff] }
  0x49   :  { %493 = vmatpush.msra.mxu2 %v204_v12  ;;  %512 = vmatpush.msra.mxu3 %v221_v13  ;;  %v219_v22 = vld [vmem:[%s1521_s1 + $0x5e0] sm:$0xff]  ;;  %v22_v24 = vld [vmem:[%s1520_s0 + $0x38] sm:$0x3f]  ;;  %v169_v25 = vld [vmem:[%s1521_s1 + $0x450] sm:$0xff] }
  0x4a   :  { %454 = vmatpush.msra.mxu0 %v171_v14  ;;  %473 = vmatpush.msra.mxu1 %v188_v15  ;;  %v19_v23 = vld [vmem:[%s1520_s0 + $0x20] sm:$0x3f]  ;;  %v186_v26 = vld [vmem:[%s1521_s1 + $0x4d8] sm:$0xff]  ;;  %v201_v27 = vld [vmem:[%s1521_s1 + $0x550] sm:$0xff] }
  0x4b   :  { %494 = vmatpush.msra.mxu2 %v203_v16  ;;  %513 = vmatpush.msra.mxu3 %v220_v17  ;;  %v218_v28 = vld [vmem:[%s1521_s1 + $0x5d8] sm:$0xff]  ;;  %v20_v29 = vld [vmem:[%s1520_s0 + $0x28] sm:$0x3f]  ;;  %v185_v31 = vld [vmem:[%s1521_s1 + $0x4d0] sm:$0xff] }
  0x4c   :  { %427 = vmatmul.f32.vlgmr.msrb.gmra.mxu2 %v21_v18  ;;  %455 = vmatpush.msra.mxu0 %v170_v19  ;;  %v168_v30 = vld [vmem:[%s1521_s1 + $0x448] sm:$0xff]  ;;  %v217_v33 = vld [vmem:[%s1521_s1 + $0x5d0] sm:$0xff]  ;;  %v167_v34 = vld [vmem:[%s1521_s1 + $0x440] sm:$0xff] }
  0x4d   :  { %474 = vmatpush.msra.mxu1 %v187_v20  ;;  %495 = vmatpush.msra.mxu2 %v202_v21  ;;  %v200_v32 = vld [vmem:[%s1521_s1 + $0x548] sm:$0xff]  ;;  %v199_v36 = vld [vmem:[%s1521_s1 + $0x540] sm:$0xff]  ;;  %v166_v38 = vld [vmem:[%s1521_s1 + $0x438] sm:$0xff] }
  0x4e   :  { %514 = vmatpush.msra.mxu3 %v219_v22  ;;  %387 = vmatmul.f32.vlgmr.msrb.gmra.mxu0 %v19_v23  ;;  %v184_v35 = vld [vmem:[%s1521_s1 + $0x4c8] sm:$0xff]  ;;  %v183_v39 = vld [vmem:[%s1521_s1 + $0x4c0] sm:$0xff]  ;;  %v198_v40 = vld [vmem:[%s1521_s1 + $0x538] sm:$0xff] }
  0x4f   :  { %447 = vmatmul.f32.vlgmr.msrb.gmra.mxu3 %v22_v24  ;;  %456 = vmatpush.msra.mxu0 %v169_v25  ;;  %v216_v37 = vld [vmem:[%s1521_s1 + $0x5c8] sm:$0xff]  ;;  %v215_v41 = vld [vmem:[%s1521_s1 + $0x5c0] sm:$0xff]  ;;  %v165_v42 = vld [vmem:[%s1521_s1 + $0x430] sm:$0xff] }
  0x50   :  { %475 = vmatpush.msra.mxu1 %v186_v26  ;;  %496 = vmatpush.msra.mxu2 %v201_v27  ;;  %v182_v43 = vld [vmem:[%s1521_s1 + $0x4b8] sm:$0xff]  ;;  %v197_v44 = vld [vmem:[%s1521_s1 + $0x530] sm:$0xff]  ;;  %v164_v46 = vld [vmem:[%s1521_s1 + $0x428] sm:$0xff] }
  0x51   :  { %515 = vmatpush.msra.mxu3 %v218_v28  ;;  %407 = vmatmul.f32.vlgmr.msrb.gmra.mxu1 %v20_v29  ;;  %v214_v45 = vld [vmem:[%s1521_s1 + $0x5b8] sm:$0xff]  ;;  %v181_v47 = vld [vmem:[%s1521_s1 + $0x4b0] sm:$0xff]  ;;  %v196_v48 = vld [vmem:[%s1521_s1 + $0x528] sm:$0xff] }
  0x52   :  { %457 = vmatpush.msra.mxu0 %v168_v30  ;;  %476 = vmatpush.msra.mxu1 %v185_v31  ;;  %v213_v49 = vld [vmem:[%s1521_s1 + $0x5b0] sm:$0xff]  ;;  %v163_v50 = vld [vmem:[%s1521_s1 + $0x420] sm:$0xff]  ;;  %v180_v51 = vld [vmem:[%s1521_s1 + $0x4a8] sm:$0xff] }
  0x53   :  { %497 = vmatpush.msra.mxu2 %v200_v32  ;;  %516 = vmatpush.msra.mxu3 %v217_v33  ;;  %v195_v52 = vld [vmem:[%s1521_s1 + $0x520] sm:$0xff]  ;;  %v212_v53 = vld [vmem:[%s1521_s1 + $0x5a8] sm:$0xff]  ;;  %v162_v54 = vld [vmem:[%s1521_s1 + $0x418] sm:$0xff] }
  0x54   :  { %458 = vmatpush.msra.mxu0 %v167_v34  ;;  %477 = vmatpush.msra.mxu1 %v184_v35  ;;  %v179_v55 = vld [vmem:[%s1521_s1 + $0x4a0] sm:$0xff]  ;;  %v194_v56 = vld [vmem:[%s1521_s1 + $0x518] sm:$0xff]  ;;  %v161_v58 = vld [vmem:[%s1521_s1 + $0x410] sm:$0xff] }
  0x55   :  { %498 = vmatpush.msra.mxu2 %v199_v36  ;;  %517 = vmatpush.msra.mxu3 %v216_v37  ;;  %v211_v57 = vld [vmem:[%s1521_s1 + $0x5a0] sm:$0xff]  ;;  %v178_v59 = vld [vmem:[%s1521_s1 + $0x498] sm:$0xff]  ;;  %v193_v60 = vld [vmem:[%s1521_s1 + $0x510] sm:$0xff] }
  0x56   :  { %459 = vmatpush.msra.mxu0 %v166_v38  ;;  %478 = vmatpush.msra.mxu1 %v183_v39  ;;  %v210_v61 = vld [vmem:[%s1521_s1 + $0x598] sm:$0xff]  ;;  %v160_v62 = vld [vmem:[%s1521_s1 + $0x408] sm:$0xff]  ;;  %v177_v63 = vld [vmem:[%s1521_s1 + $0x490] sm:$0xff] }
  0x57   :  { %499 = vmatpush.msra.mxu2 %v198_v40  ;;  %518 = vmatpush.msra.mxu3 %v215_v41  ;;  %v192_v0 = vld [vmem:[%s1521_s1 + $0x508] sm:$0xff]  ;;  %v209_v1 = vld [vmem:[%s1521_s1 + $0x590] sm:$0xff]  ;;  %v159_v2 = vld [vmem:[%s1521_s1 + $0x400] sm:$0xff] }
  0x58   :  { %460 = vmatpush.msra.mxu0 %v165_v42  ;;  %479 = vmatpush.msra.mxu1 %v182_v43  ;;  %v176_v3 = vld [vmem:[%s1521_s1 + $0x488] sm:$0xff]  ;;  %v191_v4 = vld [vmem:[%s1521_s1 + $0x500] sm:$0xff]  ;;  %v25_v7 = vld [vmem:[%s1520_s0 + $0x50] sm:$0x3f] }
  0x59   :  { %500 = vmatpush.msra.mxu2 %v197_v44  ;;  %519 = vmatpush.msra.mxu3 %v214_v45  ;;  %v208_v5 = vld [vmem:[%s1521_s1 + $0x588] sm:$0xff]  ;;  %v23_v6 = vld [vmem:[%s1520_s0 + $0x40] sm:$0x3f]  ;;  %v238_v8 = vld [vmem:[%s1521_s1 + $0x678] sm:$0xff] }
  0x5a   :  { %461 = vmatpush.msra.mxu0 %v164_v46  ;;  %480 = vmatpush.msra.mxu1 %v181_v47  ;;  %v270_v9 = vld [vmem:[%s1521_s1 + $0x778] sm:$0xff]  ;;  %v175_v10 = vld [vmem:[%s1521_s1 + $0x480] sm:$0xff]  ;;  %v24_v12 = vld [vmem:[%s1520_s0 + $0x48] sm:$0x3f] }
  0x5b   :  { %501 = vmatpush.msra.mxu2 %v196_v48  ;;  %520 = vmatpush.msra.mxu3 %v213_v49  ;;  %v207_v11 = vld [vmem:[%s1521_s1 + $0x580] sm:$0xff]  ;;  %v26_v13 = vld [vmem:[%s1520_s0 + $0x58] sm:$0x3f]  ;;  %v237_v14 = vld [vmem:[%s1521_s1 + $0x670] sm:$0xff] }
  0x5c   :  { %462 = vmatpush.msra.mxu0 %v163_v50  ;;  %481 = vmatpush.msra.mxu1 %v180_v51  ;;  %v254_v15 = vld [vmem:[%s1521_s1 + $0x6f8] sm:$0xff]  ;;  %v269_v16 = vld [vmem:[%s1521_s1 + $0x770] sm:$0xff]  ;;  %v236_v18 = vld [vmem:[%s1521_s1 + $0x668] sm:$0xff] }
  0x5d   :  { %502 = vmatpush.msra.mxu2 %v195_v52  ;;  %521 = vmatpush.msra.mxu3 %v212_v53  ;;  %v286_v17 = vld [vmem:[%s1521_s1 + $0x7f8] sm:$0xff]  ;;  %v253_v19 = vld [vmem:[%s1521_s1 + $0x6f0] sm:$0xff]  ;;  %v268_v20 = vld [vmem:[%s1521_s1 + $0x768] sm:$0xff] }
  0x5e   :  { %463 = vmatpush.msra.mxu0 %v162_v54  ;;  %482 = vmatpush.msra.mxu1 %v179_v55  ;;  %v285_v21 = vld [vmem:[%s1521_s1 + $0x7f0] sm:$0xff]  ;;  %v235_v22 = vld [vmem:[%s1521_s1 + $0x660] sm:$0xff]  ;;  %v252_v23 = vld [vmem:[%s1521_s1 + $0x6e8] sm:$0xff] }
  0x5f   :  { %503 = vmatpush.msra.mxu2 %v194_v56  ;;  %522 = vmatpush.msra.mxu3 %v211_v57  ;;  %v267_v24 = vld [vmem:[%s1521_s1 + $0x760] sm:$0xff]  ;;  %v284_v25 = vld [vmem:[%s1521_s1 + $0x7e8] sm:$0xff]  ;;  %v234_v26 = vld [vmem:[%s1521_s1 + $0x658] sm:$0xff] }
  0x60   :  { %464 = vmatpush.msra.mxu0 %v161_v58  ;;  %483 = vmatpush.msra.mxu1 %v178_v59  ;;  %v251_v27 = vld [vmem:[%s1521_s1 + $0x6e0] sm:$0xff]  ;;  %v266_v28 = vld [vmem:[%s1521_s1 + $0x758] sm:$0xff]  ;;  %v233_v30 = vld [vmem:[%s1521_s1 + $0x650] sm:$0xff] }
  0x61   :  { %504 = vmatpush.msra.mxu2 %v193_v60  ;;  %523 = vmatpush.msra.mxu3 %v210_v61  ;;  %v283_v29 = vld [vmem:[%s1521_s1 + $0x7e0] sm:$0xff]  ;;  %v250_v31 = vld [vmem:[%s1521_s1 + $0x6d8] sm:$0xff]  ;;  %v265_v32 = vld [vmem:[%s1521_s1 + $0x750] sm:$0xff] }
  0x62   :  { %465 = vmatpush.msra.mxu0 %v160_v62  ;;  %484 = vmatpush.msra.mxu1 %v177_v63  ;;  %v282_v33 = vld [vmem:[%s1521_s1 + $0x7d8] sm:$0xff]  ;;  %v232_v34 = vld [vmem:[%s1521_s1 + $0x648] sm:$0xff]  ;;  %v249_v35 = vld [vmem:[%s1521_s1 + $0x6d0] sm:$0xff] }
  0x63   :  { %505 = vmatpush.msra.mxu2 %v192_v0  ;;  %524 = vmatpush.msra.mxu3 %v209_v1  ;;  %v264_v36 = vld [vmem:[%s1521_s1 + $0x748] sm:$0xff]  ;;  %v281_v37 = vld [vmem:[%s1521_s1 + $0x7d0] sm:$0xff]  ;;  %v231_v38 = vld [vmem:[%s1521_s1 + $0x640] sm:$0xff] }
  0x64   :  { %466 = vmatpush.msra.mxu0 %v159_v2  ;;  %485 = vmatpush.msra.mxu1 %v176_v3  ;;  %v248_v39 = vld [vmem:[%s1521_s1 + $0x6c8] sm:$0xff]  ;;  %v263_v40 = vld [vmem:[%s1521_s1 + $0x740] sm:$0xff]  ;;  %v230_v42 = vld [vmem:[%s1521_s1 + $0x638] sm:$0xff] }
  0x65   :  { %506 = vmatpush.msra.mxu2 %v191_v4  ;;  %525 = vmatpush.msra.mxu3 %v208_v5  ;;  %v280_v41 = vld [vmem:[%s1521_s1 + $0x7c8] sm:$0xff]  ;;  %v247_v43 = vld [vmem:[%s1521_s1 + $0x6c0] sm:$0xff]  ;;  %v262_v44 = vld [vmem:[%s1521_s1 + $0x738] sm:$0xff] }
  0x66   :  { %467 = vmatmul.f32.vlgmr.msra.gmra.mxu0 %v23_v6  ;;  %507 = vmatmul.f32.vlgmr.msra.gmra.mxu2 %v25_v7  ;;  %v279_v45 = vld [vmem:[%s1521_s1 + $0x7c0] sm:$0xff]  ;;  %v229_v46 = vld [vmem:[%s1521_s1 + $0x630] sm:$0xff]  ;;  %v246_v47 = vld [vmem:[%s1521_s1 + $0x6b8] sm:$0xff] }
  0x67   :  { %531 = vmatpush.msrb.mxu0 %v238_v8  ;;  %571 = vmatpush.msrb.mxu2 %v270_v9  ;;  %v261_v48 = vld [vmem:[%s1521_s1 + $0x730] sm:$0xff]  ;;  %v278_v49 = vld [vmem:[%s1521_s1 + $0x7b8] sm:$0xff]  ;;  %v228_v50 = vld [vmem:[%s1521_s1 + $0x628] sm:$0xff] }
  0x68   :  { %486 = vmatpush.msra.mxu1 %v175_v10  ;;  %526 = vmatpush.msra.mxu3 %v207_v11  ;;  %v245_v51 = vld [vmem:[%s1521_s1 + $0x6b0] sm:$0xff]  ;;  %v260_v52 = vld [vmem:[%s1521_s1 + $0x728] sm:$0xff]  ;;  %v227_v54 = vld [vmem:[%s1521_s1 + $0x620] sm:$0xff] }
  0x69   :  { %487 = vmatmul.f32.vlgmr.msra.gmra.mxu1 %v24_v12  ;;  %527 = vmatmul.f32.vlgmr.msra.gmra.mxu3 %v26_v13  ;;  %v277_v53 = vld [vmem:[%s1521_s1 + $0x7b0] sm:$0xff]  ;;  %v244_v55 = vld [vmem:[%s1521_s1 + $0x6a8] sm:$0xff]  ;;  %v259_v56 = vld [vmem:[%s1521_s1 + $0x720] sm:$0xff] }
  0x6a   :  { %532 = vmatpush.msrb.mxu0 %v237_v14  ;;  %551 = vmatpush.msrb.mxu1 %v254_v15  ;;  %v276_v57 = vld [vmem:[%s1521_s1 + $0x7a8] sm:$0xff]  ;;  %v226_v58 = vld [vmem:[%s1521_s1 + $0x618] sm:$0xff]  ;;  %v243_v59 = vld [vmem:[%s1521_s1 + $0x6a0] sm:$0xff] }
  0x6b   :  { %572 = vmatpush.msrb.mxu2 %v269_v16  ;;  %591 = vmatpush.msrb.mxu3 %v286_v17  ;;  %v258_v60 = vld [vmem:[%s1521_s1 + $0x718] sm:$0xff]  ;;  %v275_v61 = vld [vmem:[%s1521_s1 + $0x7a0] sm:$0xff]  ;;  %v225_v62 = vld [vmem:[%s1521_s1 + $0x610] sm:$0xff] }
  0x6c   :  { %533 = vmatpush.msrb.mxu0 %v236_v18  ;;  %552 = vmatpush.msrb.mxu1 %v253_v19  ;;  %v242_v63 = vld [vmem:[%s1521_s1 + $0x698] sm:$0xff]  ;;  %v257_v0 = vld [vmem:[%s1521_s1 + $0x710] sm:$0xff]  ;;  %v224_v2 = vld [vmem:[%s1521_s1 + $0x608] sm:$0xff] }
  0x6d   :  { %573 = vmatpush.msrb.mxu2 %v268_v20  ;;  %592 = vmatpush.msrb.mxu3 %v285_v21  ;;  %v274_v1 = vld [vmem:[%s1521_s1 + $0x798] sm:$0xff]  ;;  %v241_v3 = vld [vmem:[%s1521_s1 + $0x690] sm:$0xff]  ;;  %v256_v4 = vld [vmem:[%s1521_s1 + $0x708] sm:$0xff] }
  0x6e   :  { %534 = vmatpush.msrb.mxu0 %v235_v22  ;;  %553 = vmatpush.msrb.mxu1 %v252_v23  ;;  %v273_v5 = vld [vmem:[%s1521_s1 + $0x790] sm:$0xff]  ;;  %v223_v6 = vld [vmem:[%s1521_s1 + $0x600] sm:$0xff]  ;;  %v240_v7 = vld [vmem:[%s1521_s1 + $0x688] sm:$0xff] }
  0x6f   :  { %574 = vmatpush.msrb.mxu2 %v267_v24  ;;  %593 = vmatpush.msrb.mxu3 %v284_v25  ;;  %v255_v8 = vld [vmem:[%s1521_s1 + $0x700] sm:$0xff]  ;;  %v272_v9 = vld [vmem:[%s1521_s1 + $0x788] sm:$0xff]  ;;  %v29_v11 = vld [vmem:[%s1520_s0 + $0x70] sm:$0x3f] }
  0x70   :  { %535 = vmatpush.msrb.mxu0 %v234_v26  ;;  %554 = vmatpush.msrb.mxu1 %v251_v27  ;;  %v27_v10 = vld [vmem:[%s1520_s0 + $0x60] sm:$0x3f]  ;;  %v28_v14 = vld [vmem:[%s1520_s0 + $0x68] sm:$0x3f]  ;;  %v30_v15 = vld [vmem:[%s1520_s0 + $0x78] sm:$0x3f] }
  0x71   :  { %575 = vmatpush.msrb.mxu2 %v266_v28  ;;  %594 = vmatpush.msrb.mxu3 %v283_v29  ;;  %v239_v12 = vld [vmem:[%s1521_s1 + $0x680] sm:$0xff]  ;;  %s675_s0 = smov [#allocation2]  }
  0x72   :  { %536 = vmatpush.msrb.mxu0 %v233_v30  ;;  %555 = vmatpush.msrb.mxu1 %v250_v31  ;;  %v271_v13 = vld [vmem:[%s1521_s1 + $0x780] sm:$0xff]  ;;  %s634_s1 = sshll.u32 %s675_s0, 4  ;;  %s635_s1 = int_to_ptr.vmem [resolvable:$true] %s634_s1 }
  0x73   :  { %576 = vmatpush.msrb.mxu2 %v265_v32  ;;  %595 = vmatpush.msrb.mxu3 %v282_v33  ;;  %v646_v16 = vld [vmem:[%s1522_s2] ss:$0 sm:$0xff] }
  0x74   :  { %537 = vmatpush.msrb.mxu0 %v232_v34  ;;  %556 = vmatpush.msrb.mxu1 %v249_v35 }
  0x75   :  { %577 = vmatpush.msrb.mxu2 %v264_v36  ;;  %596 = vmatpush.msrb.mxu3 %v281_v37 }
  0x76   :  { %538 = vmatpush.msrb.mxu0 %v231_v38  ;;  %557 = vmatpush.msrb.mxu1 %v248_v39 }
  0x77   :  { %578 = vmatpush.msrb.mxu2 %v263_v40  ;;  %597 = vmatpush.msrb.mxu3 %v280_v41 }
  0x78   :  { %539 = vmatpush.msrb.mxu0 %v230_v42  ;;  %558 = vmatpush.msrb.mxu1 %v247_v43 }
  0x79   :  { %579 = vmatpush.msrb.mxu2 %v262_v44  ;;  %598 = vmatpush.msrb.mxu3 %v279_v45 }
  0x7a   :  { %540 = vmatpush.msrb.mxu0 %v229_v46  ;;  %559 = vmatpush.msrb.mxu1 %v246_v47 }
  0x7b   :  { %580 = vmatpush.msrb.mxu2 %v261_v48  ;;  %599 = vmatpush.msrb.mxu3 %v278_v49 }
  0x7c   :  { %541 = vmatpush.msrb.mxu0 %v228_v50  ;;  %560 = vmatpush.msrb.mxu1 %v245_v51 }
  0x7d   :  { %581 = vmatpush.msrb.mxu2 %v260_v52  ;;  %600 = vmatpush.msrb.mxu3 %v277_v53 }
  0x7e   :  { %542 = vmatpush.msrb.mxu0 %v227_v54  ;;  %561 = vmatpush.msrb.mxu1 %v244_v55 }
  0x7f   :  { %582 = vmatpush.msrb.mxu2 %v259_v56  ;;  %601 = vmatpush.msrb.mxu3 %v276_v57 }
  0x80   :  { %543 = vmatpush.msrb.mxu0 %v226_v58  ;;  %562 = vmatpush.msrb.mxu1 %v243_v59 }
  0x81   :  { %583 = vmatpush.msrb.mxu2 %v258_v60  ;;  %602 = vmatpush.msrb.mxu3 %v275_v61 }
  0x82   :  { %544 = vmatpush.msrb.mxu0 %v225_v62  ;;  %563 = vmatpush.msrb.mxu1 %v242_v63 }
  0x83   :  { %584 = vmatpush.msrb.mxu2 %v257_v0  ;;  %603 = vmatpush.msrb.mxu3 %v274_v1 }
  0x84   :  { %545 = vmatpush.msrb.mxu0 %v224_v2  ;;  %564 = vmatpush.msrb.mxu1 %v241_v3 }
  0x85   :  { %585 = vmatpush.msrb.mxu2 %v256_v4  ;;  %604 = vmatpush.msrb.mxu3 %v273_v5 }
  0x86   :  { %546 = vmatpush.msrb.mxu0 %v223_v6  ;;  %565 = vmatpush.msrb.mxu1 %v240_v7 }
  0x87   :  { %586 = vmatpush.msrb.mxu2 %v255_v8  ;;  %605 = vmatpush.msrb.mxu3 %v272_v9 }
  0x88   :  { %547 = vmatmul.f32.vlgmr.msrb.gmra.mxu0 %v27_v10  ;;  %587 = vmatmul.f32.vlgmr.msrb.gmra.mxu2 %v29_v11 }
  0x89   :  { %566 = vmatpush.msrb.mxu1 %v239_v12  ;;  %606 = vmatpush.msrb.mxu3 %v271_v13 }
  0x8a   :  { %567 = vmatmul.f32.vlgmr.msrb.gmra.mxu1 %v28_v14  ;;  %607 = vmatmul.f32.vlgmr.msrb.gmra.mxu3 %v30_v15 }
  0xbf   :  { %v308_v17 = vpop.f32.mrf.mxu0 }
  0xc0   :  { %v309_v18 = vadd.f32 %v646_v16, %v308_v17 }
  0xc2   :  { %v328_v19 = vpop.f32.mrf.mxu1 }
  0xc3   :  { %v329_v20 = vadd.f32 %v328_v19, %v309_v18 }
  0xc5   :  { %v348_v21 = vpop.f32.mrf.mxu2 }
  0xc6   :  { %v349_v22 = vadd.f32 %v348_v21, %v329_v20 }
  0xc8   :  { %v368_v23 = vpop.f32.mrf.mxu3 }
  0xc9   :  { %v369_v24 = vadd.f32 %v368_v23, %v349_v22 }
  0xcb   :  { %v388_v25 = vpop.f32.mrf.mxu0 }
  0xcc   :  { %v389_v26 = vadd.f32 %v388_v25, %v369_v24 }
  0xce   :  { %v408_v27 = vpop.f32.mrf.mxu1 }
  0xcf   :  { %v409_v28 = vadd.f32 %v408_v27, %v389_v26  ;;  %v428_v29 = vpop.f32.mrf.mxu2 }
  0xd1   :  { %v429_v30 = vadd.f32 %v428_v29, %v409_v28 }
  0xd2   :  { %v448_v31 = vpop.f32.mrf.mxu3 }
  0xd3   :  { %v449_v33 = vadd.f32 %v448_v31, %v429_v30 }
  0xe3   :  { %v468_v32 = vpop.f32.mrf.mxu0 }
  0xe4   :  { %v469_v34 = vadd.f32 %v468_v32, %v449_v33 }
  0xe6   :  { %v488_v35 = vpop.f32.mrf.mxu1 }
  0xe7   :  { %v489_v37 = vadd.f32 %v488_v35, %v469_v34 }
  0xe9   :  { %v508_v36 = vpop.f32.mrf.mxu2 }
  0xea   :  { %v509_v38 = vadd.f32 %v508_v36, %v489_v37 }
  0xec   :  { %v528_v39 = vpop.f32.mrf.mxu3 }
  0xed   :  { %v529_v40 = vadd.f32 %v528_v39, %v509_v38 }
 0x105   :  { %v548_v41 = vpop.f32.mrf.mxu0 }
 0x106   :  { %v549_v42 = vadd.f32 %v548_v41, %v529_v40 }
 0x107   :  { %v568_v43 = vpop.f32.mrf.mxu1 }
 0x108   :  { %v569_v44 = vadd.f32 %v568_v43, %v549_v42 }
 0x10b   :  { %v588_v45 = vpop.f32.mrf.mxu2 }
 0x10c   :  { %v589_v46 = vadd.f32 %v588_v45, %v569_v44 }
 0x10d   :  { %v608_v47 = vpop.f32.mrf.mxu3 }
 0x10e   :  { %v609_v48 = vadd.f32 %v608_v47, %v589_v46 }
 0x110   :  { %v611_v49 = vmul.f32 %v609_v48, %v609_v48 }
 0x112   :  { %v613_v50 = vsel %vm612_vm0, %v611_v49, 0.0 }
 0x113   :  { %614 = vadd.xlane.f32.xlu0 %v613_v50 }
 0x186   :  { %v615_v51 = vpop.xlane.xlu0 %614 }
 0x187   :  { %v616_v52 = vmax.f32 %v615_v51, 1e-24 }
 0x189   :  { %647 = vrsqrt.f32 %v616_v52  ;;  %vm623_vm2 = vweird.f32 %v616_v52 }
 0x18f   :  { %v648_v53 = vpop.eup %647 }
 0x190   :  { %v618_v54 = vmul.f32 %v648_v53, %v616_v52  ;;  %vm624_vm1 = vweird.f32 %v648_v53 }
 0x191   :  { %vm625_vm3 = vmor %vm623_vm2, %vm624_vm1 }
 0x192   :  { %v619_v55 = vmul.f32 %v648_v53, %v618_v54 }
 0x194   :  { %v620_v56 = vmul.f32 0.5, %v619_v55 }
 0x196   :  { %v621_v57 = vsub.f32 1.5, %v620_v56 }
 0x198   :  { %v622_v58 = vmul.f32 %v648_v53, %v621_v57 }
 0x19a   :  { %v626_v59 = vsel %vm625_vm3, %v648_v53, %v622_v58 }
 0x19b   :  { %v627_v60 = vmul.f32 %v626_v59, %v609_v48 }
 0x19d   :  { %628 = vst.msk [vmem:[#allocation2] sm:$0x3f] %vm612_vm0, %v627_v60 }
 0x19e   :  { %639 = dma.vmem_to_hbm [thread:$0]  %s635_s1, 128, %s637_s19, [#allocation3]  }
 0x19f   :  { %673 = dma.done.wait [#allocation3], 128  }
 0x1a0   :  { %674 = vsyncadd [#allocation3], 4294967168 }
 0x1a1   :  { %644 = vsyncpa [#allocation3], 1 }

</bundles_post_ra>
